<compile_context>
chip_gen: v5e
topology: v5e:2x2
jax: 0.10.0
libtpu: 0.0.40
codegen_flags: <defaults>
</compile_context>

<pallas_src>
import jax
import jax.numpy as jnp
from jax import lax
from jax.experimental import pallas as pl
from jax.experimental.pallas import tpu as pltpu


_VMEM_LIMIT_BYTES = 48 * 1024 * 1024   # conservative vs. v7x's 64 MiB/TC physical VMEM
_VMEM_TILE_BUDGET = 40 * 1024 * 1024   # headroom for weights / output / regalloc


# ---------------------------------------------------------------------------
# Fused kernel: merged conv matmul + mask + max-pool + bias/ReLU + FC + log_softmax
# ---------------------------------------------------------------------------
def _make_fused_kernel(kernel_sizes, seq_len, kernel_num, compute_dtype):
    """kernel_sizes: static tuple of conv heights K; seq_len: original (unpadded) L."""
    n = len(kernel_sizes)
    k_max = max(kernel_sizes)

    def kernel(x_ref, w_ref, b_ref, fcw_ref, fcb_ref, o_ref):
        TB, Lp, E = x_ref.shape
        nC = w_ref.shape[1]
        rows = TB * Lp

        # (TB, Lp, E) -> (TB*Lp, E) is a layout no-op: Lp padded to the sublane pack.
        x2 = x_ref[...].reshape(rows, E)

        # im2col slab built ONCE at K_max width; tap k is an XLU sublane roll so that
        # row r = b*Lp + t picks up x[b, t+k, :].  Wrapped / cross-batch rows only
        # appear at positions masked before the pool or under zero-padded weight taps.
        taps = [x2]
        for k in range(1, k_max):
            taps.append(pltpu.roll(x2, shift=rows - k, axis=0))    # == roll by -k
        slab = jnp.concatenate(taps, axis=1)                        # (rows, K_max*E)

        # One MXU matmul for ALL conv branches (weights tap/branch-merged in wrapper).
        y = jnp.dot(slab, w_ref[...], preferred_element_type=jnp.float32)
        y = y.reshape(TB, Lp, nC)

        # Valid-length mask: single hoisted time iota + per-channel-group limit.
        t_idx = lax.broadcasted_iota(jnp.int32, (1, Lp, 1), 1)
        c_idx = lax.broadcasted_iota(jnp.int32, (1, 1, nC), 2)
        t_lim = jnp.full((1, 1, nC), seq_len - kernel_sizes[0] + 1, jnp.int32)
        for i in range(1, n):
            t_lim = jnp.where(c_idx >= i * kernel_num,
                              jnp.int32(seq_len - kernel_sizes[i] + 1), t_lim)
        y = jnp.where(t_idx < t_lim, y, -jnp.inf)

        # Time max-pool, then bias + ReLU (hoisting past the pool is exact:
        # per-channel, time-constant bias and monotone ReLU).
        feat = jnp.maximum(jnp.max(y, axis=1) + b_ref[...], 0.0)    # (TB, nC) f32

        # FC + log_softmax.  Padded logit columns carry a -1e30 bias -> exp()==0,
        # so they don't perturb the real columns and are sliced away outside.
        z = jnp.dot(feat.astype(compute_dtype), fcw_ref[...],
                    preferred_element_type=jnp.float32) + fcb_ref[...]
        m = jnp.max(z, axis=-1, keepdims=True)
        s = z - m
        lse = jnp.log(jnp.sum(jnp.exp(s), axis=-1, keepdims=True))
        o_ref[...] = (s - lse).astype(o_ref.dtype)

    return kernel


def _pick_batch_tile(B, Lp, E, nC, k_max, cb, budget_bytes):
    """Size the batch tile from live VMEM (x tile, K_max-wide slab + roll temps,
    f32 conv output), then cap so the batch grid has >= 2 steps for the 2 v7x TCs."""
    per_row = Lp * (3 * E * cb + 2 * k_max * E * cb + 2 * nC * 4)
    tb = budget_bytes // max(per_row, 1)
    tb = min(tb, -(-B // 2))            # >= 2 grid steps whenever B > 1
    tb = (tb // 8) * 8                  # output block rule: TB % 8 == 0 ...
    if tb < 8:
        tb = B if B <= 8 else 8         # ... or TB == full batch (tiny-B fallback)
    return int(min(tb, ((B + 7) // 8) * 8))


def cnn3_fused(x, convs, fc_w, fc_b, *, batch_tile=None, compute_dtype=jnp.float32):
    """x: (B, L, E) embedded activations; convs: [(w (K,E,C), b (1,C)), ...];
    fc_w: (n*C, class_num); fc_b: (1, class_num).  Returns (B, class_num) log-probs."""
    B, L, E = x.shape
    kernel_sizes = tuple(int(w.shape[0]) for (w, _) in convs)
    k_max = max(kernel_sizes)
    C = int(convs[0][0].shape[2])
    nC = len(convs) * C
    N = int(fc_w.shape[1])
    cb = jnp.dtype(compute_dtype).itemsize

    # Pad the time axis to the sublane-packing multiple of compute_dtype so the
    # in-kernel (TB, Lp, E) <-> (TB*Lp, E) reshape stays layout-trivial
    # (8 for f32, 16 for bf16).  Padded positions are masked before the max-pool.
    pack = 8 * (4 // cb)
    Lp = ((L + pack - 1) // pack) * pack
    if Lp != L:
        x = jnp.pad(x, ((0, 0), (0, Lp - L), (0, 0)))
    x = x.astype(compute_dtype)

    # Merge the conv branches: zero-pad each weight to K_max taps, flatten, concat
    # along output channels, pre-cast to compute_dtype.
    # TODO(synk): for small models also pad E / n*C up to lane multiples (128) --
    # skipped here to avoid inflating the tiny test's x DMA bytes.
    w_cols, b_cols = [], []
    for (w, b) in convs:
        K = int(w.shape[0])
        if K < k_max:
            w = jnp.pad(w, ((0, k_max - K), (0, 0), (0, 0)))
        w_cols.append(w.reshape(k_max * E, C))
        b_cols.append(b)
    w_all = jnp.concatenate(w_cols, axis=1).astype(compute_dtype)     # (K_max*E, nC)
    b_all = jnp.concatenate(b_cols, axis=1).astype(jnp.float32)       # (1, nC)

    # Lane-dense FC output: pad logits to >= 128 columns; padded columns get a huge
    # negative bias so log_softmax ignores them; sliced away after the kernel.
    Np = max(128, ((N + 127) // 128) * 128)
    fcw_p = jnp.pad(fc_w, ((0, 0), (0, Np - N))).astype(compute_dtype)      # (nC, Np)
    fcb_p = jnp.pad(fc_b.astype(jnp.float32), ((0, 0), (0, Np - N)),
                    constant_values=-1e30)                                   # (1, Np)

    if batch_tile is None:
        batch_tile = _pick_batch_tile(B, Lp, E, nC, k_max, cb, _VMEM_TILE_BUDGET)
    TB = int(batch_tile)
    assert TB == B or TB % 8 == 0, "batch tile must equal B or be a multiple of 8"

    out = pl.pallas_call(
        _make_fused_kernel(kernel_sizes, L, C, compute_dtype),
        out_shape=jax.ShapeDtypeStruct((B, Np), jnp.float32),
        grid=(pl.cdiv(B, TB),),
        in_specs=[
            pl.BlockSpec((TB, Lp, E), lambda i: (i, 0, 0)),
            pl.BlockSpec(w_all.shape, lambda i: (0, 0)),
            pl.BlockSpec(b_all.shape, lambda i: (0, 0)),
            pl.BlockSpec(fcw_p.shape, lambda i: (0, 0)),
            pl.BlockSpec(fcb_p.shape, lambda i: (0, 0)),
        ],
        out_specs=pl.BlockSpec((TB, Np), lambda i: (i, 0)),
        compiler_params=pltpu.CompilerParams(
            dimension_semantics=("parallel",),
            vmem_limit_bytes=_VMEM_LIMIT_BYTES),
    )(x, w_all, b_all, fcw_p, fcb_p)
    return out[:, :N]


# ---------------------------------------------------------------------------
# Full forward (eval mode: dropout is identity; args.static branch is a no-op)
# ---------------------------------------------------------------------------
def cnn3_forward(params, input_x, *, batch_tile=None, compute_dtype=jnp.float32):
    # TODO(synk): for huge vocab tables, fuse the gather into the kernel with the
    # table in HBM (memory_space=pl.ANY) + scalar-prefetched indices instead of this
    # plain-JAX embedding gather.
    x = params["embed"][input_x]                      # (B, L, E)
    return cnn3_fused(x, params["convs"], params["fc_w"], params["fc_b"],
                      batch_tile=batch_tile, compute_dtype=compute_dtype)


# ---------------------------------------------------------------------------
# Pure-JAX reference for the correctness check
# ---------------------------------------------------------------------------
def cnn3_reference(params, input_x):
    x = params["embed"][input_x]
    pooled = []
    for (w, b) in params["convs"]:
        K = w.shape[0]
        T = x.shape[1] - K + 1
        acc = jnp.zeros((x.shape[0], T, w.shape[2]), jnp.float32)
        for k in range(K):
            acc = acc + jnp.einsum("ble,ec->blc", x[:, k:k + T, :], w[k])
        acc = jnp.maximum(acc + b, 0.0)
        pooled.append(jnp.max(acc, axis=1))
    feat = jnp.concatenate(pooled, axis=1)
    z = feat @ params["fc_w"] + params["fc_b"]
    return jax.nn.log_softmax(z, axis=-1)


if __name__ == "__main__":
    # Small, forward-consistent shapes (batch chosen so the batch grid has 2 steps).
    B, L = 16, 16                # batch, sequence length
    embed_dim = 32               # args.embed_dim
    num_features = 20            # args.num_features (vocab size)
    kernel_num = 8               # args.kernel_num (out channels per conv)
    kernel_sizes = (3, 4, 5)     # args.kernel_sizes
    class_num = 4                # args.class_num

    key = jax.random.PRNGKey(0)
    k_emb, k_idx, k_fcw, k_fcb, *k_convs = jax.random.split(key, 4 + 2 * len(kernel_sizes))

    params = {
        "embed": 0.1 * jax.random.normal(
            k_emb, (num_features + 1, embed_dim), jnp.float32),
        "convs": [
            (
                0.1 * jax.random.normal(k_convs[2 * i], (K, embed_dim, kernel_num),
                                        jnp.float32),
                0.1 * jax.random.normal(k_convs[2 * i + 1], (1, kernel_num), jnp.float32),
            )
            for i, K in enumerate(kernel_sizes)
        ],
        "fc_w": 0.1 * jax.random.normal(
            k_fcw, (len(kernel_sizes) * kernel_num, class_num), jnp.float32),
        "fc_b": 0.1 * jax.random.normal(k_fcb, (1, class_num), jnp.float32),
    }

    input_x = jax.random.randint(k_idx, (B, L), 0, num_features + 1, dtype=jnp.int32)

    logit = jax.block_until_ready(cnn3_forward(params, input_x))
    ref = jax.block_until_ready(cnn3_reference(params, input_x))

    assert logit.shape == (B, class_num)
    assert jnp.allclose(logit, ref, rtol=1e-3, atol=1e-3), "mismatch vs. reference"
    print("KERNEL_OK")
</pallas_src>

<mosaic_0001>
module attributes {stable_mosaic.version = 11 : i64} {
  func.func @kernel(%arg0: i32, %arg1: memref<8x16x32xf32, #tpu.memory_space<vmem>>, %arg2: memref<160x24xf32, #tpu.memory_space<vmem>>, %arg3: memref<1x24xf32, #tpu.memory_space<vmem>>, %arg4: memref<24x128xf32, #tpu.memory_space<vmem>>, %arg5: memref<1x128xf32, #tpu.memory_space<vmem>>, %arg6: memref<8x128xf32, #tpu.memory_space<vmem>>) attributes {dimension_semantics = [#tpu.dimension_semantics<parallel>], iteration_bounds = array<i64: 2>, scalar_prefetch = 0 : i64, scratch_operands = 0 : i64, tpu.core_type = #tpu.core_type<tc>, window_params = [{transform_indices = @transform_0, window_bounds = array<i64: 8, 16, 32>}, {pipeline_mode = #tpu.pipeline_mode<synchronous>, transform_indices = @transform_1, window_bounds = array<i64: 160, 24>}, {pipeline_mode = #tpu.pipeline_mode<synchronous>, transform_indices = @transform_2, window_bounds = array<i64: 1, 24>}, {pipeline_mode = #tpu.pipeline_mode<synchronous>, transform_indices = @transform_3, window_bounds = array<i64: 24, 128>}, {pipeline_mode = #tpu.pipeline_mode<synchronous>, transform_indices = @transform_4, window_bounds = array<i64: 1, 128>}, {transform_indices = @transform_5, window_bounds = array<i64: 8, 128>}]} {
    %c0 = arith.constant 0 : index
    %c0_0 = arith.constant 0 : index
    %c0_1 = arith.constant 0 : index
    %0 = vector.load %arg1[%c0, %c0_0, %c0_1] : memref<8x16x32xf32, #tpu.memory_space<vmem>>, vector<8x16x32xf32>
    %1 = vector.shape_cast %0 : vector<8x16x32xf32> to vector<128x32xf32>
    %c127_i32 = arith.constant 127 : i32
    %2 = tpu.dynamic_rotate %1 by %c127_i32 dim 0 : vector<128x32xf32>, i32 -> vector<128x32xf32>
    %c126_i32 = arith.constant 126 : i32
    %3 = tpu.dynamic_rotate %1 by %c126_i32 dim 0 : vector<128x32xf32>, i32 -> vector<128x32xf32>
    %c125_i32 = arith.constant 125 : i32
    %4 = tpu.dynamic_rotate %1 by %c125_i32 dim 0 : vector<128x32xf32>, i32 -> vector<128x32xf32>
    %c124_i32 = arith.constant 124 : i32
    %5 = tpu.dynamic_rotate %1 by %c124_i32 dim 0 : vector<128x32xf32>, i32 -> vector<128x32xf32>
    %6 = tpu.concatenate %1, %2, %3, %4, %5 in 1 : vector<128x32xf32>, vector<128x32xf32>, vector<128x32xf32>, vector<128x32xf32>, vector<128x32xf32> -> vector<128x160xf32>
    %c0_2 = arith.constant 0 : index
    %c0_3 = arith.constant 0 : index
    %7 = vector.load %arg2[%c0_2, %c0_3] : memref<160x24xf32, #tpu.memory_space<vmem>>, vector<160x24xf32>
    %cst = arith.constant dense<0.000000e+00> : vector<128x24xf32>
    %8 = tpu.matmul %6, %7, %cst {dimension_numbers = #tpu.dot_dimension_numbers<[1], [0], [0], [1], [0, 0, 1, 1], [], []>} : vector<128x160xf32>, vector<160x24xf32>, vector<128x24xf32> -> vector<128x24xf32>
    %9 = vector.shape_cast %8 : vector<128x24xf32> to vector<8x16x24xf32>
    %10 = tpu.iota {dimensions = array<i32: 1>} : vector<1x16x1xi32>
    %11 = tpu.iota {dimensions = array<i32: 2>} : vector<1x1x24xi32>
    %c14_i32 = arith.constant 14 : i32
    %12 = vector.broadcast %c14_i32 : i32 to vector<1x1x24xi32>
    %c8_i32 = arith.constant 8 : i32
    %13 = vector.broadcast %c8_i32 : i32 to vector<1x1x24xi32>
    %14 = arith.cmpi sge, %11, %13 : vector<1x1x24xi32>
    %c13_i32 = arith.constant 13 : i32
    %15 = vector.broadcast %c13_i32 : i32 to vector<1x1x24xi32>
    %16 = arith.select %14, %15, %12 : vector<1x1x24xi1>, vector<1x1x24xi32>
    %c16_i32 = arith.constant 16 : i32
    %17 = vector.broadcast %c16_i32 : i32 to vector<1x1x24xi32>
    %18 = arith.cmpi sge, %11, %17 : vector<1x1x24xi32>
    %c12_i32 = arith.constant 12 : i32
    %19 = vector.broadcast %c12_i32 : i32 to vector<1x1x24xi32>
    %20 = arith.select %18, %19, %16 : vector<1x1x24xi1>, vector<1x1x24xi32>
    %21 = vector.broadcast %10 : vector<1x16x1xi32> to vector<1x16x24xi32>
    %22 = vector.broadcast %20 : vector<1x1x24xi32> to vector<1x16x24xi32>
    %23 = arith.cmpi slt, %21, %22 : vector<1x16x24xi32>
    %cst_4 = arith.constant 0xFF800000 : f32
    %24 = vector.shape_cast %23 : vector<1x16x24xi1> to vector<1x16x24xi1>
    %25 = vector.broadcast %24 : vector<1x16x24xi1> to vector<8x16x24xi1>
    %26 = vector.broadcast %cst_4 : f32 to vector<8x16x24xf32>
    %27 = arith.select %25, %9, %26 : vector<8x16x24xi1>, vector<8x16x24xf32>
    %cst_5 = arith.constant dense<0xFF800000> : vector<8x24xf32>
    %28 = vector.multi_reduction <maximumf>, %27, %cst_5 [1] : vector<8x16x24xf32> to vector<8x24xf32>
    %c0_6 = arith.constant 0 : index
    %c0_7 = arith.constant 0 : index
    %29 = vector.load %arg3[%c0_6, %c0_7] : memref<1x24xf32, #tpu.memory_space<vmem>>, vector<1x24xf32>
    %30 = vector.broadcast %29 : vector<1x24xf32> to vector<8x24xf32>
    %31 = arith.addf %28, %30 : vector<8x24xf32>
    %cst_8 = arith.constant 0.000000e+00 : f32
    %32 = vector.broadcast %cst_8 : f32 to vector<8x24xf32>
    %33 = arith.maximumf %31, %32 : vector<8x24xf32>
    %c0_9 = arith.constant 0 : index
    %c0_10 = arith.constant 0 : index
    %34 = vector.load %arg4[%c0_9, %c0_10] : memref<24x128xf32, #tpu.memory_space<vmem>>, vector<24x128xf32>
    %cst_11 = arith.constant dense<0.000000e+00> : vector<8x128xf32>
    %35 = tpu.matmul %33, %34, %cst_11 {dimension_numbers = #tpu.dot_dimension_numbers<[1], [0], [0], [1], [0, 0, 1, 1], [], []>} : vector<8x24xf32>, vector<24x128xf32>, vector<8x128xf32> -> vector<8x128xf32>
    %c0_12 = arith.constant 0 : index
    %c0_13 = arith.constant 0 : index
    %36 = vector.load %arg5[%c0_12, %c0_13] : memref<1x128xf32, #tpu.memory_space<vmem>>, vector<1x128xf32>
    %37 = vector.broadcast %36 : vector<1x128xf32> to vector<8x128xf32>
    %38 = arith.addf %35, %37 : vector<8x128xf32>
    %cst_14 = arith.constant dense<0xFF800000> : vector<8xf32>
    %39 = vector.multi_reduction <maximumf>, %38, %cst_14 [1] : vector<8x128xf32> to vector<8xf32>
    %40 = vector.shape_cast %39 : vector<8xf32> to vector<8x1xf32>
    %41 = vector.broadcast %40 : vector<8x1xf32> to vector<8x128xf32>
    %42 = arith.subf %38, %41 : vector<8x128xf32>
    %43 = math.exp %42 : vector<8x128xf32>
    %cst_15 = arith.constant dense<0.000000e+00> : vector<8xf32>
    %44 = vector.multi_reduction <add>, %43, %cst_15 [1] : vector<8x128xf32> to vector<8xf32>
    %45 = vector.shape_cast %44 : vector<8xf32> to vector<8x1xf32>
    %46 = math.log %45 : vector<8x1xf32>
    %47 = vector.broadcast %46 : vector<8x1xf32> to vector<8x128xf32>
    %48 = arith.subf %42, %47 : vector<8x128xf32>
    %c0_16 = arith.constant 0 : index
    %c0_17 = arith.constant 0 : index
    %49 = vector.load %arg6[%c0_16, %c0_17] : memref<8x128xf32, #tpu.memory_space<vmem>>, vector<8x128xf32>
    tpu.vector_store %arg6[%c0_16, %c0_17], %48 {strides = array<i32>} : memref<8x128xf32, #tpu.memory_space<vmem>>, vector<8x128xf32>,
    return
  }
  func.func @transform_0(%arg0: i32) -> (i32, i32, i32) {
    %c0_i32 = arith.constant 0 : i32
    %c0_i32_0 = arith.constant 0 : i32
    %c0_i32_1 = arith.constant 0 : i32
    return %arg0, %c0_i32, %c0_i32_0 : i32, i32, i32
  }
  func.func @transform_1(%arg0: i32) -> (i32, i32) {
    %c0_i32 = arith.constant 0 : i32
    %c0_i32_0 = arith.constant 0 : i32
    %c0_i32_1 = arith.constant 0 : i32
    return %c0_i32, %c0_i32_0 : i32, i32
  }
  func.func @transform_2(%arg0: i32) -> (i32, i32) {
    %c0_i32 = arith.constant 0 : i32
    %c0_i32_0 = arith.constant 0 : i32
    %c0_i32_1 = arith.constant 0 : i32
    return %c0_i32, %c0_i32_0 : i32, i32
  }
  func.func @transform_3(%arg0: i32) -> (i32, i32) {
    %c0_i32 = arith.constant 0 : i32
    %c0_i32_0 = arith.constant 0 : i32
    %c0_i32_1 = arith.constant 0 : i32
    return %c0_i32, %c0_i32_0 : i32, i32
  }
  func.func @transform_4(%arg0: i32) -> (i32, i32) {
    %c0_i32 = arith.constant 0 : i32
    %c0_i32_0 = arith.constant 0 : i32
    %c0_i32_1 = arith.constant 0 : i32
    return %c0_i32, %c0_i32_0 : i32, i32
  }
  func.func @transform_5(%arg0: i32) -> (i32, i32) {
    %c0_i32 = arith.constant 0 : i32
    %c0_i32_0 = arith.constant 0 : i32
    return %arg0, %c0_i32 : i32, i32
  }
}

</mosaic_0001>

<bundles_post_ra>
// kernel: tpu_custom_call.1
= control target key start
LH: loop header
LB: loop body
LE: loop exit
PB: predicated region body
PF: predicated region fallthrough
CT: control target
= control target key end

     0   :  { %10 = vsyncpa [#allocation3], 0  ;;  %s2147_s0 = inlined_call_operand.hbm [shape: f32[16,16,32], index: 0, kind: input, shape index: {}]   ;;  %s2148_s1 = inlined_call_operand.vmem [shape: f32[160,24], index: 1, kind: input, shape index: {}]   ;;  %s2149_s2 = inlined_call_operand.vmem [shape: f32[1,24], index: 2, kind: input, shape index: {}]   ;;  %s2150_s3 = inlined_call_operand.vmem [shape: f32[24,128], index: 3, kind: input, shape index: {}]   ;;  %s2151_s4 = inlined_call_operand.vmem [shape: f32[1,128], index: 4, kind: input, shape index: {}]   ;;  %s2152_s5 = inlined_call_operand.hbm [shape: f32[16,128], index: 5, kind: output, shape index: {}]  }
   0x1   :  { %12 = vsyncpa [#allocation3 + $0x1], 0 }
   0x2   :  { %13 = vsyncpa [#allocation4], 0 }
   0x3   :  { %15 = vsyncpa [#allocation4 + $0x1], 0  ;;  %s1491_s18 = smov 0   ;;  %s1493_s19 = smov 0  }
   0x4   :  { %s1495_s20 = smov 0   ;;  %s1497_s21 = smov 0  }
   0x5 LB: > { %s1512_s22 = sadd.s32 4294967295, %s1453_s21   ;;  %s1115_s23 = sadd.s32 4294967294, %s1453_s21   ;;  %s1453_s21 = sphi %s1497_s21, %s2164_s21   ;;  %s1449_s20 = sphi %s1495_s20, %s2163_s20   ;;  %s1445_s19 = sphi %s1493_s19, %s2162_s19   ;;  %s1441_s18 = sphi %s1491_s18, %s2161_s18  }
   0x6   : > { %s1516_s24 = sadd.s32 1, %s1453_s21   ;;  %s28_s25 = sadd.s32 1, %s1449_s20 }
   0x7   : > { %s25_s26 = ssub.s32 %s1453_s21, %s1516_s24  ;;  %p35_p0 = scmp.ne.s32.totalorder %s1449_s20, %s1445_s19 }
   0x8   : > { %p26_p1 = scmp.eq.s32.totalorder %s25_s26, 0  ;;  %p36_p2 = scmp.eq.s32.totalorder %s1453_s21, 0 }
   0x9   : > { %p41_p3 = scmp.ne.s32.totalorder %s1445_s19, %s1441_s18  ;;  %p42_p4 = scmp.eq.s32.totalorder %s1512_s22, 0 }
   0xa   : > { %s1528_s27 = scalar_select %p26_p1, %s1449_s20, %s28_s25  }
   0xb   : > { %p1530_p5 = por %p36_p2, %p35_p0  ;;  %p1534_p6 = por %p42_p4, %p41_p3 }
   0xc   : > { %p149_p7 = scmp.eq.s32.totalorder %s1512_s22, 1  ;;  %p155_p8 = scmp.eq.s32.totalorder %s1115_s23, 1 }
   0xd   : > { %p1196_p10 = scmp.lt.s32.totalorder %s1453_s21, 2  ;;  %s187_s7 = sand.u32 1, %s1449_s20  }
   0xe   : > { %p1541_p11 = por %p149_p7, %p35_p0  ;;  %p1545_p12 = por %p155_p8, %p41_p3 }
   0xf   : > { %s1147_s8 = sshll.u32 %s1453_s21, 7  ;;  %s1118_s9 = sshll.u32 %s187_s7, 7 }
  0x10   : > { %s197_s12 = scalar_lea.hbm %s2147_s0, %s1147_s8  ;;  %s191_s14 = scalar_lea.vmem [#allocation2], %s1118_s9 }
  0x11   : > { %s198_s13 = sshll.u32 %s197_s12, 4  ;;  %s200_s15 = sshll.u32 %s191_s14, 4  ;;  %s199_s13 = int_to_ptr.hbm [resolvable:$true] %s198_s13  ;;  %s201_s15 = int_to_ptr.vmem [resolvable:$true] %s200_s15 }
  0x12   : > { %p1556_p13 = pnand %p1196_p10, %p1530_p5  ;;  %p1122_p0 = scmp.ge.s32.totalorder %s1453_s21, 1 }
  0x13   : > { %p208_p1 = scmp.lt.s32.totalorder %s1453_s21, 3  ;;  %s188_s17 = scalar_lea.sflag [#allocation3], %s187_s7 }
  0x14   : > { %s1357_s23 = sshra.s32 %s199_s13, 4  ;;  %p1361_p3 = pneg %p1556_p13  ;;  %s1358_s23 = int_to_ptr.hbm [resolvable:$true] %s1357_s23 }
  0x15   : > { %s1359_s25 = scalar_lea.hbm %s1358_s23, 128  ;;  %s1364_s28 = scalar_lea.hbm %s2147_s0, 256 }
  0x16   : > { %p1360_p2 = scmp.ne.s32.totalorder %s1358_s23, %s1359_s25  ;;  %p1365_p5 = scmp.lt.s32.totalorder %s1358_s23, %s2147_s0 }
  0x17   : > { %p1366_p8 = scmp.lt.s32.totalorder %s1364_s28, %s1359_s25 }
  0x18   : > { %p1362_p4 = pnand %p1361_p3, %p1360_p2 }
  0x19   : > { %p1367_p10 = por %p1366_p8, %p1365_p5 }
  0x1a   : > { %p1363_p7 = pneg %p1362_p4 }
  0x1c   : > { %p1368_p9 = pnand %p1367_p10, %p1363_p7 }
  0x1e   : > { %1371 = shalt.err (!%p1368_p9)
}
  0x1f   : > { %s1455_s7 = smov 128   ;;  %s1456_s11 = smov 8  }
  0x20   : > { %1191 = dma.hbm_to_vmem [thread:$0]  (!%p1556_p13), %s199_s13, 2048, %s201_s15, %s188_s17, %s1455_s7, %s1455_s7, %s1456_s11  }
  0x21   : > { %p209_p2 = pnand %p1122_p0, %p208_p1 }
  0x22   : > { %s1577_s12 = sand.u32 (!%p209_p2), 1, %s1445_s19  }
  0x23   : > { %212 = sbr.rel (%p209_p2) target bundleno = 780 (0x30c), region = 40  ;;  %s1123_s14 = sshll.u32 (!%p209_p2), %s1577_s12, 7 }
  0x24   : > { %s215_s23 = scalar_lea.sflag (!%p209_p2), [#allocation3], %s1577_s12  ;;  %s1581_s25 = scalar_lea.vmem (!%p209_p2), [#allocation2], %s1123_s14 }
  0x28   : > { %1432 = dma.done.wait (%p1534_p6), %s215_s23, 2048  }
  0x29   : > { %1434 = vsyncadd (%p1534_p6), %s215_s23, 4294965248  ;;  %v279_v0 = vlaneseq  ;;  %v1591_v2 = vld [vmem:[%s1581_s25 + $0x38] sm:$0xff]  ;;  %v1594_v3 = vld [vmem:[%s1581_s25 + $0x40] sm:$0xff]  ;;  %s1457_s29 = smov 96   ;;  %s1458_s13 = smov 32   ;;  %vm589_vm4 = vcmask 261120  }
  0x2a   : > { %v1597_v4 = vld [vmem:[%s1581_s25 + $0x48] sm:$0xff]  ;;  %v338_v5 = vrot.slane %v1591_v2, 3  ;;  %v339_v6 = vrot.slane %v1594_v3, 3  ;;  %v270_v8 = vrot.slane %v1591_v2, 1  ;;  %v1606_v9 = vld [vmem:[%s1581_s25] sm:$0xff]  ;;  %v271_v10 = vrot.slane %v1594_v3, 1 }
  0x2b   : > { %v1588_v1 = vshrl.u32 %v279_v0, 7  ;;  %v340_v7 = vrot.slane %v1597_v4, 3  ;;  %v272_v11 = vrot.slane %v1597_v4, 1  ;;  %v305_v12 = vrot.slane %v1591_v2, 2  ;;  %v1612_v13 = vld [vmem:[%s1581_s25 + $0x8] sm:$0xff]  ;;  %v1615_v14 = vld [vmem:[%s1581_s25 + $0x50] sm:$0xff] }
  0x2c   : > { %v306_v17 = vrot.slane %v1594_v3, 2  ;;  %v263_v18 = vrot.slane %v1606_v9, 1  ;;  %v307_v22 = vrot.slane %v1597_v4, 2  ;;  %v264_v24 = vrot.slane %v1612_v13, 1  ;;  %v1650_v30 = vld [vmem:[%s1581_s25 + $0x10] sm:$0xff]  ;;  %v1653_v31 = vld [vmem:[%s1581_s25 + $0x58] sm:$0xff] }
  0x2d   : > { %vm347_vm0 = vcmp.lt.s32.totalorder %v1588_v1, 5  ;;  %vm281_vm1 = vcmp.lt.s32.totalorder %v1588_v1, 7  ;;  %vm314_vm2 = vcmp.lt.s32.totalorder %v1588_v1, 6  ;;  %v273_v25 = vrot.slane %v1615_v14, 1  ;;  %s1459_s15 = smov 64   ;;  %v1683_v51 = vld [vmem:[%s1581_s25 + $0x18] sm:$0xff] }
  0x2e   : > { %v354_v15 = vsel %vm347_vm0, %v339_v6, %v340_v7  ;;  %v355_v16 = vsel %vm347_vm0, %v338_v5, %v339_v6  ;;  %v288_v20 = vsel %vm281_vm1, %v271_v10, %v272_v11  ;;  %v289_v21 = vsel %vm281_vm1, %v270_v8, %v271_v10  ;;  %v1686_v52 = vld [vmem:[%s1581_s25 + $0x60] sm:$0xff]  ;;  %s1124_s11 = sshll.u32 %s1577_s12, 3  ;;  %s1143_s14 = sshll.u32 %s1512_s22, 3 }
  0x2f   : > { %v1246_v19 = vpack.i.bf16 %v355_v16, %v354_v15  ;;  %v1236_v23 = vpack.i.bf16 %v289_v21, %v288_v20  ;;  %v287_v26 = vsel %vm281_vm1, %v272_v11, %v273_v25  ;;  %v296_v27 = vsel %vm281_vm1, %v263_v18, %v264_v24  ;;  %v1712_v15 = vld [vmem:[%s1581_s25 + $0x20] sm:$0xff]  ;;  %v1715_v16 = vld [vmem:[%s1581_s25 + $0x68] sm:$0xff]  ;;  %s1040_s16 = scalar_lea.hbm %s2152_s5, %s1143_s14  ;;  %s245_s17 = scalar_lea.vmem [#allocation5], %s1124_s11 }
  0x30   : > { %v321_v28 = vsel %vm314_vm2, %v306_v17, %v307_v22  ;;  %v322_v29 = vsel %vm314_vm2, %v305_v12, %v306_v17  ;;  %v308_v32 = vrot.slane %v1615_v14, 2  ;;  %v1251_v33 = vpack.i.bf16 %v296_v27, %v287_v26  ;;  %s1042_s26 = sshll.u32 %s245_s17, 4  ;;  %s1044_s8 = sshll.u32 %s1040_s16, 4  ;;  %s1043_s26 = int_to_ptr.vmem [resolvable:$true] %s1042_s26  ;;  %s1045_s8 = int_to_ptr.hbm [resolvable:$true] %s1044_s8 }
  0x31   : > { %1247 = vrot.lane.b32.xlu1 %v1246_v19, %s1457_s29  ;;  %1237 = vrot.lane.b32.xlu0 %v1236_v23, %s1458_s13  ;;  %v299_v34 = vrot.slane %v1612_v13, 2  ;;  %v298_v35 = vrot.slane %v1606_v9, 2  ;;  %v1241_v36 = vpack.i.bf16 %v322_v29, %v321_v28  ;;  %v300_v37 = vrot.slane %v1650_v30, 2  ;;  %v1729_v29 = vld [vmem:[%s1581_s25 + $0x28] sm:$0xff]  ;;  %s1407_s9 = scalar_lea.hbm %s2152_s5, 16 }
  0x32   : > { %v309_v38 = vrot.slane %v1653_v31, 2  ;;  %v320_v39 = vsel %vm314_vm2, %v307_v22, %v308_v32  ;;  %v265_v40 = vrot.slane %v1650_v30, 1  ;;  %v274_v41 = vrot.slane %v1653_v31, 1 }
  0x33   : > { %v329_v42 = vsel %vm314_vm2, %v298_v35, %v299_v34  ;;  %v331_v44 = vrot.slane %v1606_v9, 3  ;;  %v332_v45 = vrot.slane %v1612_v13, 3  ;;  %v328_v47 = vsel %vm314_vm2, %v299_v34, %v300_v37 }
  0x34   : > { %v1256_v43 = vpack.i.bf16 %v329_v42, %v320_v39  ;;  %v319_v46 = vsel %vm314_vm2, %v308_v32, %v309_v38  ;;  %v341_v48 = vrot.slane %v1615_v14, 3  ;;  %v286_v49 = vsel %vm281_vm1, %v273_v25, %v274_v41  ;;  %v1732_v32 = vld [vmem:[%s1581_s25 + $0x70] sm:$0xff] }
  0x35   : > { %v295_v50 = vsel %vm281_vm1, %v264_v24, %v265_v40  ;;  %v362_v53 = vsel %vm347_vm0, %v331_v44, %v332_v45  ;;  %v1271_v55 = vpack.i.bf16 %v328_v47, %v319_v46  ;;  %v301_v57 = vrot.slane %v1683_v51, 2 }
  0x36   : > { %1257 = vrot.lane.b32.xlu2 %v1256_v43, %s1459_s15  ;;  %v353_v54 = vsel %vm347_vm0, %v340_v7, %v341_v48  ;;  %v1266_v56 = vpack.i.bf16 %v295_v50, %v286_v49  ;;  %v310_v58 = vrot.slane %v1686_v52, 2  ;;  %v266_v60 = vrot.slane %v1683_v51, 1 }
  0x37   : > { %v1261_v59 = vpack.i.bf16 %v362_v53, %v353_v54  ;;  %v275_v61 = vrot.slane %v1686_v52, 1  ;;  %v333_v62 = vrot.slane %v1650_v30, 3  ;;  %v342_v63 = vrot.slane %v1653_v31, 3 }
  0x38   : > { %v318_v6 = vsel %vm314_vm2, %v309_v38, %v310_v58  ;;  %v327_v7 = vsel %vm314_vm2, %v300_v37, %v301_v57  ;;  %v294_v11 = vsel %vm281_vm1, %v265_v40, %v266_v60  ;;  %v302_v22 = vrot.slane %v1712_v15, 2  ;;  %v1746_v37 = vld [vmem:[%s2148_s1 + $0x98] sm:$0xff]  ;;  %v1751_v38 = vld [vmem:[%s2148_s1 + $0x90] sm:$0xff] }
  0x39   : > { %1252 = vrot.lane.b32.xlu1 %v1251_v33, %s1458_s13  ;;  %1242 = vrot.lane.b32.xlu0 %v1241_v36, %s1459_s15  ;;  %v285_v10 = vsel %vm281_vm1, %v274_v41, %v275_v61  ;;  %v352_v17 = vsel %vm347_vm0, %v341_v48, %v342_v63  ;;  %v361_v19 = vsel %vm347_vm0, %v332_v45, %v333_v62  ;;  %v311_v23 = vrot.slane %v1715_v16, 2  ;;  %v1735_v33 = vld [vmem:[%s1581_s25 + $0x30] sm:$0xff] }
  0x3a   : > { %v1286_v20 = vpack.i.bf16 %v327_v7, %v318_v6  ;;  %v1281_v21 = vpack.i.bf16 %v294_v11, %v285_v10  ;;  %v1276_v24 = vpack.i.bf16 %v361_v19, %v352_v17  ;;  %v267_v25 = vrot.slane %v1712_v15, 1  ;;  %785 = vmatpush.msra.mxu1 %v1746_v37  ;;  %v655_v11 = vld [vmem:[%s2148_s1 + $0x78] sm:$0xff]  ;;  %v654_v17 = vld [vmem:[%s2148_s1 + $0x70] sm:$0xff] }
  0x3b   : > { %v276_v26 = vrot.slane %v1715_v16, 1  ;;  %v334_v27 = vrot.slane %v1683_v51, 3  ;;  %v343_v28 = vrot.slane %v1686_v52, 3  ;;  %v317_v34 = vsel %vm314_vm2, %v310_v58, %v311_v23  ;;  %v1784_v58 = vld [vmem:[%s1581_s25 + $0x78] sm:$0xff]  ;;  %1148 = vmatpush.msra.mxu2 %v655_v11  ;;  %1149 = vmatpush.msra.mxu3 %v655_v11 }
  0x3c   : > { %v326_v36 = vsel %vm314_vm2, %v301_v57, %v302_v22  ;;  %v337_v39 = vrot.slane %v1735_v33, 3  ;;  %v293_v41 = vsel %vm281_vm1, %v266_v60, %v267_v25  ;;  %v268_v47 = vrot.slane %v1729_v29, 1  ;;  %786 = vmatpush.msra.mxu1 %v1751_v38  ;;  %v1793_v60 = vld [vmem:[%s2148_s1 + $0x88] sm:$0xff]  ;;  %708 = vmatpush.msra.mxu0 %v655_v11 }
  0x3d   : > { %v284_v40 = vsel %vm281_vm1, %v275_v61, %v276_v26  ;;  %v351_v42 = vsel %vm347_vm0, %v342_v63, %v343_v28  ;;  %v360_v43 = vsel %vm347_vm0, %v333_v62, %v334_v27  ;;  %v1301_v46 = vpack.i.bf16 %v326_v36, %v317_v34  ;;  %v1798_v61 = vld [vmem:[%s2148_s1 + $0x80] sm:$0xff]  ;;  %1150 = vmatpush.msra.mxu2 %v654_v17 }
  0x3e   : > { %1262 = vrot.lane.b32.xlu2 %v1261_v59, %s1457_s29  ;;  %v1769_v45 = vsel %vm347_vm0, %v337_v39, %v338_v5  ;;  %v312_v48 = vrot.slane %v1732_v32, 2  ;;  %v1296_v49 = vpack.i.bf16 %v293_v41, %v284_v40  ;;  %v303_v50 = vrot.slane %v1729_v29, 2  ;;  %787 = vmatpush.msra.mxu1 %v1793_v60  ;;  %v652_v40 = vld [vmem:[%s2148_s1 + $0x60] sm:$0xff] }
  0x3f   : > { %v1291_v53 = vpack.i.bf16 %v360_v43, %v351_v42  ;;  %v277_v54 = vrot.slane %v1732_v32, 1  ;;  %v292_v5 = vsel %vm281_vm1, %v267_v25, %v268_v47  ;;  %v364_v62 = vrot.slane %v1606_v9, 4  ;;  %1151 = vmatpush.msra.mxu3 %v654_v17  ;;  %709 = vmatpush.msra.mxu0 %v654_v17 }
  0x40   : > { %v316_v57 = vsel %vm314_vm2, %v311_v23, %v312_v48  ;;  %v325_v59 = vsel %vm314_vm2, %v302_v22, %v303_v50  ;;  %v365_v63 = vrot.slane %v1612_v13, 4  ;;  %vm380_vm3 = vcmp.lt.s32.totalorder %v1588_v1, 4  ;;  %788 = vmatpush.msra.mxu1 %v1798_v61  ;;  %v653_v23 = vld [vmem:[%s2148_s1 + $0x68] sm:$0xff] }
  0x41   : > { %1272 = vrot.lane.b32.xlu1 %v1271_v55, %s1459_s15  ;;  %1267 = vrot.lane.b32.xlu0 %v1266_v56, %s1458_s13  ;;  %v335_v55 = vrot.slane %v1712_v15, 3  ;;  %v344_v56 = vrot.slane %v1715_v16, 3  ;;  %v283_v6 = vsel %vm281_vm1, %v276_v26, %v277_v54  ;;  %v278_v22 = vrot.slane %v1784_v58, 1 }
  0x42   : > { %v395_v19 = vsel %vm380_vm3, %v364_v62, %v365_v63  ;;  %v304_v25 = vrot.slane %v1735_v33, 2  ;;  %v313_v26 = vrot.slane %v1784_v58, 2  ;;  %v345_v34 = vrot.slane %v1732_v32, 3  ;;  %1152 = vmatpush.msra.mxu2 %v653_v23  ;;  %1153 = vmatpush.msra.mxu3 %v653_v23 }
  0x43   : > { %v350_v7 = vsel %vm347_vm0, %v343_v28, %v344_v56  ;;  %v359_v10 = vsel %vm347_vm0, %v334_v27, %v335_v55  ;;  %1125 = vmatmul.msk.f32.vlgmr.msra.gmra.mxu1 %vm589_vm4, %v395_v19  ;;  %v336_v28 = vrot.slane %v1729_v29, 3  ;;  %v366_v36 = vrot.slane %v1650_v30, 4  ;;  %710 = vmatpush.msra.mxu0 %v653_v23 }
  0x44   : > { %v1306_v27 = vpack.i.bf16 %v359_v10, %v350_v7  ;;  %v282_v41 = vsel %vm281_vm1, %v277_v54, %v278_v22  ;;  %v315_v43 = vsel %vm314_vm2, %v312_v48, %v313_v26  ;;  %1154 = vmatpush.msra.mxu2 %v652_v40  ;;  %1155 = vmatpush.msra.mxu3 %v652_v40  ;;  %v650_v48 = vld [vmem:[%s2148_s1 + $0x50] sm:$0xff]  ;;  %vm606_vm5 = vcmask 523264  }
  0x45   : > { %v358_v54 = vsel %vm347_vm0, %v335_v55, %v336_v28  ;;  %711 = vmatpush.msra.mxu0 %v652_v40  ;;  %v346_v55 = vrot.slane %v1784_v58, 3  ;;  %v323_v7 = vsel %vm314_vm2, %v304_v25, %v305_v12  ;;  %v330_v10 = vsel %vm314_vm2, %v313_v26, %v298_v35  ;;  %v647_v35 = vld [vmem:[%s2148_s1 + $0x38] sm:$0xff]  ;;  %v642_v40 = vld [vmem:[%s2148_s1 + $0x10] sm:$0xff] }
  0x46   : > { %1277 = vrot.lane.b32.xlu2 %v1276_v24, %s1457_s29  ;;  %v1311_v24 = vpack.i.bf16 %v292_v5, %v283_v6  ;;  %v297_v6 = vsel %vm281_vm1, %v278_v22, %v263_v18  ;;  %v357_v18 = vsel %vm347_vm0, %v336_v28, %v337_v39  ;;  %v1346_v17 = vpack.i.bf16 %v323_v7, %v330_v10  ;;  %v646_v39 = vld [vmem:[%s2148_s1 + $0x30] sm:$0xff]  ;;  %v644_v28 = vld [vmem:[%s2148_s1 + $0x20] sm:$0xff] }
  0x47   : > { %v348_v11 = vsel %vm347_vm0, %v345_v34, %v346_v55  ;;  %v363_v23 = vsel %vm347_vm0, %v346_v55, %v331_v44  ;;  %v370_v26 = vrot.slane %v1735_v33, 4  ;;  %v371_v44 = vrot.slane %v1591_v2, 4 }
  0x48   : > { %vm623_vm6 = vcmask 785408   ;;  %vm867_vm10 = vcmask 195584   ;;  %vm976_vm11 = vcmask 1041409   ;;  %vm979_vm12 = vcmask 1042434  }
  0x49   : > { %1287 = vrot.lane.b32.xlu1 %v1286_v20, %s1459_s15  ;;  %1282 = vrot.lane.b32.xlu0 %v1281_v21, %s1458_s13  ;;  %v1316_v20 = vpack.i.bf16 %v325_v59, %v316_v57  ;;  %v269_v21 = vrot.slane %v1735_v33, 1  ;;  %v649_v59 = vld [vmem:[%s2148_s1 + $0x48] sm:$0xff]  ;;  %vm982_vm13 = vcmask 1043459   ;;  %vm985_vm14 = vcmask 1044484  }
  0x4a   : > { %vm988_vm15 = vcmask 1045509  }
  0x4b   : > { %v291_v42 = vsel %vm281_vm1, %v268_v47, %v269_v21  ;;  %v394_v47 = vsel %vm380_vm3, %v365_v63, %v366_v36  ;;  %v290_v63 = vsel %vm281_vm1, %v269_v21, %v270_v8  ;;  %v648_v8 = vld [vmem:[%s2148_s1 + $0x40] sm:$0xff]  ;;  %v368_v21 = vrot.slane %v1712_v15, 4 }
  0x4c   : > { %v1326_v5 = vpack.i.bf16 %v291_v42, %v282_v41  ;;  %1126 = vmatmul.msk.f32.gmra.mxu1 %vm589_vm4, %v394_v47  ;;  %v1341_v19 = vpack.i.bf16 %v290_v63, %v297_v6  ;;  %v372_v41 = vrot.slane %v1594_v3, 4  ;;  %v641_v42 = vld [vmem:[%s2148_s1 + $0x8] sm:$0xff]  ;;  %v374_v47 = vrot.slane %v1615_v14, 4 }
  0x4d   : > { %vm994_vm1 = vcmask 1047559  }
  0x4e   : > { %1292 = vrot.lane.b32.xlu2 %v1291_v53, %s1457_s29  ;;  %v349_v53 = vsel %vm347_vm0, %v344_v56, %v345_v34  ;;  %v367_v56 = vrot.slane %v1683_v51, 4  ;;  %v389_v34 = vsel %vm380_vm3, %v370_v26, %v371_v44  ;;  %vm991_vm0 = vcmask 1046534  }
  0x4f   : > { %v1321_v57 = vpack.i.bf16 %v358_v54, %v349_v53 }
  0x50   : > { %v393_v12 = vsel %vm380_vm3, %v366_v36, %v367_v56  ;;  %v392_v22 = vsel %vm380_vm3, %v367_v56, %v368_v21  ;;  %v643_v36 = vld [vmem:[%s2148_s1 + $0x18] sm:$0xff] }
  0x51   : > { %1302 = vrot.lane.b32.xlu1 %v1301_v46, %s1459_s15  ;;  %1297 = vrot.lane.b32.xlu0 %v1296_v49, %s1458_s13  ;;  %v324_v46 = vsel %vm314_vm2, %v303_v50, %v304_v25  ;;  %v651_v49 = vld [vmem:[%s2148_s1 + $0x58] sm:$0xff] }
  0x52   : > { %v1331_v50 = vpack.i.bf16 %v324_v46, %v315_v43  ;;  %1156 = vmatpush.msra.mxu2 %v651_v49  ;;  %1157 = vmatpush.msra.mxu3 %v651_v49  ;;  %v640_v43 = vld [vmem:[%s2148_s1] sm:$0xff]  ;;  %v388_v46 = vsel %vm380_vm3, %v371_v44, %v372_v41 }
  0x53   : > { %712 = vmatpush.msra.mxu0 %v651_v49  ;;  %v373_v49 = vrot.slane %v1597_v4, 4 }
  0x54   : > { %1158 = vmatpush.msra.mxu2 %v650_v48  ;;  %1159 = vmatpush.msra.mxu3 %v650_v48 }
  0x55   : > { %713 = vmatpush.msra.mxu0 %v650_v48  ;;  %1127 = vmatmul.msk.f32.gmra.mxu1 %vm589_vm4, %v393_v12  ;;  %v387_v54 = vsel %vm380_vm3, %v372_v41, %v373_v49  ;;  %v386_v48 = vsel %vm380_vm3, %v373_v49, %v374_v47 }
  0x56   : > { %1307 = vrot.lane.b32.xlu2 %v1306_v27, %s1457_s29  ;;  %1160 = vmatpush.msra.mxu2 %v649_v59 }
  0x57   : > { %1161 = vmatpush.msra.mxu3 %v649_v59  ;;  %714 = vmatpush.msra.mxu0 %v649_v59 }
  0x58   : > { %1162 = vmatpush.msra.mxu2 %v648_v8 }
  0x59   : > { %1317 = vrot.lane.b32.xlu1 %v1316_v20, %s1459_s15  ;;  %1312 = vrot.lane.b32.xlu0 %v1311_v24, %s1458_s13  ;;  %v1336_v20 = vpack.i.bf16 %v357_v18, %v348_v11  ;;  %v369_v24 = vrot.slane %v1729_v29, 4 }
  0x5a   : > { %1163 = vmatpush.msra.mxu3 %v648_v8  ;;  %715 = vmatpush.msra.mxu0 %v648_v8 }
  0x5b   : > { %1164 = vmatpush.msra.mxu2 %v647_v35  ;;  %v391_v25 = vsel %vm380_vm3, %v368_v21, %v369_v24  ;;  %v390_v27 = vsel %vm380_vm3, %v369_v24, %v370_v26 }
  0x5c   : > { %1165 = vmatpush.msra.mxu3 %v647_v35  ;;  %716 = vmatpush.msra.mxu0 %v647_v35 }
  0x5d   : > { %1166 = vmatpush.msra.mxu2 %v646_v39  ;;  %1128 = vmatmul.msk.f32.gmra.mxu1 %vm589_vm4, %v392_v22 }
  0x5e   : > { %1322 = vrot.lane.b32.xlu2 %v1321_v57, %s1457_s29  ;;  %1167 = vmatpush.msra.mxu3 %v646_v39 }
  0x5f   : > { %717 = vmatpush.msra.mxu0 %v646_v39 }
  0x61   : > { %1332 = vrot.lane.b32.xlu1 %v1331_v50, %s1459_s15  ;;  %1327 = vrot.lane.b32.xlu0 %v1326_v5, %s1458_s13 }
  0x65   : > { %1129 = vmatmul.msk.f32.gmra.mxu1 %vm589_vm4, %v391_v25 }
  0x66   : > { %1337 = vrot.lane.b32.xlu2 %v1336_v20, %s1457_s29 }
  0x69   : > { %1347 = vrot.lane.b32.xlu1 %v1346_v17, %s1459_s15  ;;  %1342 = vrot.lane.b32.xlu0 %v1341_v19, %s1458_s13  ;;  %s1030_s13 = scalar_lea.sflag [#allocation4], %s1577_s12  ;;  %s1401_s15 = sshra.s32 %s1045_s8, 4  ;;  %s1402_s15 = int_to_ptr.hbm [resolvable:$true] %s1401_s15 }
  0x6a   : > { %s1403_s28 = scalar_lea.hbm %s1402_s15, 8  ;;  %p1408_p0 = scmp.lt.s32.totalorder %s1402_s15, %s2152_s5 }
  0x6b   : > { %p1404_p6 = scmp.ne.s32.totalorder %s1402_s15, %s1403_s28  ;;  %p1409_p1 = scmp.lt.s32.totalorder %s1407_s9, %s1403_s28 }
  0x6d   : > { %1130 = vmatmul.msk.f32.gmra.mxu1 %vm589_vm4, %v390_v27  ;;  %p1405_p9 = pnand %p1404_p6, %p1541_p11  ;;  %p1410_p3 = por %p1409_p1, %p1408_p0 }
  0x6e   : > { %571 = vrot.lane.b32.xlu2 %v363_v23, %s1457_s29 }
  0x6f   : > { %p1406_p13 = pneg %p1405_p9 }
  0x71   : > { %553 = vrot.lane.b32.xlu0 %v1769_v45, %s1457_s29  ;;  %v645_v45 = vld [vmem:[%s2148_s1 + $0x28] sm:$0xff]  ;;  %p1411_p4 = pnand %p1410_p3, %p1406_p13 }
  0x72   : > { %1168 = vmatpush.msra.mxu2 %v645_v45  ;;  %1169 = vmatpush.msra.mxu3 %v645_v45 }
  0x73   : > { %718 = vmatpush.msra.mxu0 %v645_v45 }
  0x74   : > { %1170 = vmatpush.msra.mxu2 %v644_v28  ;;  %1171 = vmatpush.msra.mxu3 %v644_v28 }
  0x75   : > { %1131 = vmatmul.msk.f32.gmra.mxu1 %vm589_vm4, %v389_v34  ;;  %719 = vmatpush.msra.mxu0 %v644_v28 }
  0x76   : > { %1172 = vmatpush.msra.mxu2 %v643_v36  ;;  %1173 = vmatpush.msra.mxu3 %v643_v36 }
  0x77   : > { %720 = vmatpush.msra.mxu0 %v643_v36 }
  0x78   : > { %1174 = vmatpush.msra.mxu2 %v642_v40  ;;  %1175 = vmatpush.msra.mxu3 %v642_v40 }
  0x79   : > { %721 = vmatpush.msra.mxu0 %v642_v40 }
  0x7a   : > { %1176 = vmatpush.msra.mxu2 %v641_v42  ;;  %1177 = vmatpush.msra.mxu3 %v641_v42 }
  0x7b   : > { %722 = vmatpush.msra.mxu0 %v641_v42 }
  0x7c   : > { %1178 = vmatpush.msra.mxu2 %v640_v43  ;;  %1179 = vmatpush.msra.mxu3 %v640_v43 }
  0x7d   : > { %1132 = vmatmul.msk.f32.gmra.mxu1 %vm589_vm4, %v388_v46  ;;  %723 = vmatpush.msra.mxu0 %v640_v43 }
  0x7e   : > { %1180 = vmatpush.msrb.mxu2 %v1746_v37 }
  0x80   : > { %1181 = vmatpush.msrb.mxu2 %v1751_v38 }
  0x82   : > { %1182 = vmatpush.msrb.mxu2 %v1793_v60 }
  0x84   : > { %1183 = vmatpush.msrb.mxu2 %v1798_v61 }
  0x85   : > { %1133 = vmatmul.msk.f32.gmra.mxu1 %vm589_vm4, %v387_v54  ;;  %v376_v54 = vrot.slane %v1686_v52, 4 }
  0x8d   : > { %1134 = vmatmul.msk.f32.gmra.mxu1 %vm589_vm4, %v386_v48 }
  0x90   : > { %v1258_v53 = vpop.permute.xlu2 %1257 }
  0x91   : > { %v1260_v55 = vunpack.i.h.bf16 %v1258_v53  ;;  %v1259_v23 = vunpack.i.l.bf16 %v1258_v53 }
  0x98   : > { %v1263_v37 = vpop.permute.xlu2 %1262 }
  0x99   : > { %v1265_v6 = vunpack.i.h.bf16 %v1263_v37  ;;  %v1264_v25 = vunpack.i.l.bf16 %v1263_v37 }
  0xa0   : > { %v1278_v57 = vpop.permute.xlu2 %1277 }
  0xa1   : > { %v1280_v34 = vunpack.i.h.bf16 %v1278_v57  ;;  %v1279_v53 = vunpack.i.l.bf16 %v1278_v57 }
  0xa3   : > { %v1248_v38 = vpop.permute.xlu1 %1247  ;;  %v1238_v50 = vpop.permute.xlu0 %1237 }
  0xa4   : > { %v1240_v5 = vunpack.i.h.bf16 %v1238_v50  ;;  %v1239_v60 = vunpack.i.l.bf16 %v1238_v50  ;;  %v1250_v61 = vunpack.i.h.bf16 %v1248_v38  ;;  %v1249_v7 = vunpack.i.l.bf16 %v1248_v38 }
  0xa6   : > { %v597_v18 = vsel %vm589_vm4, %v1591_v2, %v1240_v5  ;;  %v598_v12 = vsel %vm589_vm4, %v1594_v3, %v1239_v60  ;;  %v375_v3 = vrot.slane %v1653_v31, 4 }
  0xa8   : > { %v1293_v44 = vpop.permute.xlu2 %1292  ;;  %v385_v40 = vsel %vm380_vm3, %v374_v47, %v375_v3 }
  0xa9   : > { %v1295_v5 = vunpack.i.h.bf16 %v1293_v44 }
  0xab   : > { %v1253_v56 = vpop.permute.xlu1 %1252  ;;  %v1243_v59 = vpop.permute.xlu0 %1242 }
  0xac   : > { %v1255_v63 = vunpack.i.h.bf16 %v1253_v56  ;;  %v1245_v10 = vunpack.i.h.bf16 %v1243_v59  ;;  %v1244_v8 = vunpack.i.l.bf16 %v1243_v59  ;;  %v1254_v11 = vunpack.i.l.bf16 %v1253_v56 }
  0xae   : > { %v590_v35 = vsel %vm589_vm4, %v1606_v9, %v1255_v63  ;;  %v614_v17 = vsel %vm606_vm5, %v597_v18, %v1245_v10  ;;  %v615_v19 = vsel %vm606_vm5, %v598_v12, %v1244_v8  ;;  %v599_v2 = vsel %vm589_vm4, %v1597_v4, %v1254_v11 }
  0xaf   : > { %v607_v20 = vsel %vm606_vm5, %v590_v35, %v1260_v55  ;;  %v631_v39 = vsel %vm623_vm6, %v614_v17, %v1250_v61  ;;  %v632_v21 = vsel %vm623_vm6, %v615_v19, %v1249_v7  ;;  %v616_v36 = vsel %vm606_vm5, %v599_v2, %v1259_v23 }
  0xb0   : > { %v624_v22 = vsel %vm623_vm6, %v607_v20, %v1265_v6  ;;  %745 = vmatmul.f32.vlgmr.msra.gmra.mxu2 %v631_v39  ;;  %748 = vmatmul.f32.vlgmr.msra.gmra.mxu3 %v632_v21  ;;  %v633_v4 = vsel %vm623_vm6, %v616_v36, %v1264_v25  ;;  %v384_v55 = vsel %vm380_vm3, %v375_v3, %v376_v54  ;;  %v1294_v61 = vunpack.i.l.bf16 %v1293_v44 }
  0xb1   : > { %724 = vmatmul.f32.vlgmr.msra.gmra.mxu0 %v624_v22  ;;  %v377_v7 = vrot.slane %v1715_v16, 4  ;;  %v378_v3 = vrot.slane %v1732_v32, 4 }
  0xb3   : > { %v1273_v24 = vpop.permute.xlu1 %1272  ;;  %v1268_v26 = vpop.permute.xlu0 %1267 }
  0xb4   : > { %v1275_v27 = vunpack.i.h.bf16 %v1273_v24  ;;  %v1270_v45 = vunpack.i.h.bf16 %v1268_v26  ;;  %v1269_v28 = vunpack.i.l.bf16 %v1268_v26  ;;  %v1274_v41 = vunpack.i.l.bf16 %v1273_v24 }
  0xb6   : > { %v591_v42 = vsel %vm589_vm4, %v1612_v13, %v1270_v45  ;;  %v600_v46 = vsel %vm589_vm4, %v1615_v14, %v1269_v28  ;;  %v1308_v14 = vpop.permute.xlu2 %1307 }
  0xb7   : > { %v608_v43 = vsel %vm606_vm5, %v591_v42, %v1275_v27  ;;  %v617_v48 = vsel %vm606_vm5, %v600_v46, %v1274_v41  ;;  %v1310_v35 = vunpack.i.h.bf16 %v1308_v14  ;;  %v1309_v2 = vunpack.i.l.bf16 %v1308_v14 }
  0xb8   : > { %751 = vmatmul.f32.gmra.mxu3 %v633_v4  ;;  %v625_v49 = vsel %vm623_vm6, %v608_v43, %v1280_v34  ;;  %1135 = vmatmul.msk.f32.vlgmr.msrb.gmra.mxu2 %vm589_vm4, %v385_v40  ;;  %v634_v60 = vsel %vm623_vm6, %v617_v48, %v1279_v53  ;;  %v379_v46 = vrot.slane %v1784_v58, 4 }
  0xb9   : > { %727 = vmatmul.f32.gmra.mxu0 %v625_v49 }
  0xbb   : > { %v1288_v47 = vpop.permute.xlu1 %1287  ;;  %v1283_v13 = vpop.permute.xlu0 %1282 }
  0xbc   : > { %v1290_v37 = vunpack.i.h.bf16 %v1288_v47  ;;  %v1285_v38 = vunpack.i.h.bf16 %v1283_v13  ;;  %v1284_v50 = vunpack.i.l.bf16 %v1283_v13  ;;  %v1289_v56 = vunpack.i.l.bf16 %v1288_v47 }
  0xbe   : > { %v592_v57 = vsel %vm589_vm4, %v1650_v30, %v1285_v38  ;;  %v601_v63 = vsel %vm589_vm4, %v1653_v31, %v1284_v50  ;;  %v383_v31 = vsel %vm380_vm3, %v376_v54, %v377_v7  ;;  %v1323_v21 = vpop.permute.xlu2 %1322 }
  0xbf   : > { %v609_v59 = vsel %vm606_vm5, %v592_v57, %v1290_v37  ;;  %v618_v8 = vsel %vm606_vm5, %v601_v63, %v1289_v56  ;;  %v1325_v45 = vunpack.i.h.bf16 %v1323_v21  ;;  %v1324_v4 = vunpack.i.l.bf16 %v1323_v21 }
  0xc0   : > { %754 = vmatmul.f32.gmra.mxu3 %v634_v60  ;;  %v626_v6 = vsel %vm623_vm6, %v609_v59, %v1295_v5  ;;  %1136 = vmatmul.msk.f32.gmra.mxu2 %vm589_vm4, %v384_v55  ;;  %v635_v17 = vsel %vm623_vm6, %v618_v8, %v1294_v61  ;;  %v381_v37 = vsel %vm380_vm3, %v378_v3, %v379_v46 }
  0xc1   : > { %730 = vmatmul.f32.gmra.mxu0 %v626_v6 }
  0xc3   : > { %v1303_v10 = vpop.permute.xlu1 %1302  ;;  %v1298_v11 = vpop.permute.xlu0 %1297 }
  0xc4   : > { %v1305_v18 = vunpack.i.h.bf16 %v1303_v10  ;;  %v1300_v30 = vunpack.i.h.bf16 %v1298_v11  ;;  %v1299_v12 = vunpack.i.l.bf16 %v1298_v11  ;;  %v1304_v19 = vunpack.i.l.bf16 %v1303_v10 }
  0xc6   : > { %v593_v20 = vsel %vm589_vm4, %v1683_v51, %v1300_v30  ;;  %v602_v22 = vsel %vm589_vm4, %v1686_v52, %v1299_v12  ;;  %v382_v52 = vsel %vm380_vm3, %v377_v7, %v378_v3  ;;  %v1338_v43 = vpop.permute.xlu2 %1337 }
  0xc7   : > { %v610_v39 = vsel %vm606_vm5, %v593_v20, %v1305_v18  ;;  %v619_v25 = vsel %vm606_vm5, %v602_v22, %v1304_v19  ;;  %v1340_v13 = vunpack.i.h.bf16 %v1338_v43  ;;  %v1339_v55 = vunpack.i.l.bf16 %v1338_v43 }
  0xc8   : > { %757 = vmatmul.f32.gmra.mxu3 %v635_v17  ;;  %v627_v23 = vsel %vm623_vm6, %v610_v39, %v1310_v35  ;;  %1137 = vmatmul.msk.f32.gmra.mxu2 %vm589_vm4, %v383_v31  ;;  %v636_v28 = vsel %vm623_vm6, %v619_v25, %v1309_v2  ;;  %v790_v35 = vpop.f32.mrf.mxu1  ;;  %v840_v25 = vand.u32 127, %v279_v0 }
  0xc9   : > { %733 = vmatmul.f32.gmra.mxu0 %v627_v23 }
  0xca   : > { %vm841_vm7 = vcmp.ge.s32.totalorder %v840_v25, 8  ;;  %vm843_vm8 = vcmp.ge.s32.totalorder %v840_v25, 16 }
  0xcb   : > { %v1318_v24 = vpop.permute.xlu1 %1317  ;;  %v1313_v26 = vpop.permute.xlu0 %1312 }
  0xcc   : > { %v1320_v51 = vunpack.i.h.bf16 %v1318_v24  ;;  %v1315_v27 = vunpack.i.h.bf16 %v1313_v26  ;;  %v1314_v44 = vunpack.i.l.bf16 %v1313_v26  ;;  %v1319_v34 = vunpack.i.l.bf16 %v1318_v24 }
  0xce   : > { %v594_v36 = vsel %vm589_vm4, %v1712_v15, %v1315_v27  ;;  %v603_v41 = vsel %vm589_vm4, %v1715_v16, %v1314_v44  ;;  %v572_v18 = vpop.permute.xlu2 %571  ;;  %v962_v27 = vld [vmem:[%s2150_s3 + $0x10] sm:$0xff]  ;;  %v1460_v44 = vmov 14  }
  0xcf   : > { %v611_v40 = vsel %vm606_vm5, %v594_v36, %v1320_v51  ;;  %v620_v53 = vsel %vm606_vm5, %v603_v41, %v1319_v34  ;;  %1011 = vmatpush.msra.mxu2 %v962_v27  ;;  %v838_v34 = vadd.s32 8, %v1588_v1 }
  0xd0   : > { %760 = vmatmul.f32.gmra.mxu3 %v636_v28  ;;  %v628_v42 = vsel %vm623_vm6, %v611_v40, %v1325_v45  ;;  %1138 = vmatmul.msk.f32.gmra.mxu2 %vm589_vm4, %v382_v52  ;;  %v637_v16 = vsel %vm623_vm6, %v620_v53, %v1324_v4  ;;  %v842_v45 = vsel %vm841_vm7, 13, %v1460_v44 }
  0xd1   : > { %736 = vmatmul.f32.gmra.mxu0 %v628_v42  ;;  %v844_v36 = vsel %vm843_vm8, 12, %v842_v45 }
  0xd2   : > { %vm2061_vm9 = vcmp.lt.s32.totalorder %v838_v34, %v844_v36 }
  0xd3   : > { %v1333_v49 = vpop.permute.xlu1 %1332  ;;  %v1328_v54 = vpop.permute.xlu0 %1327 }
  0xd4   : > { %v1335_v15 = vunpack.i.h.bf16 %v1333_v49  ;;  %v1330_v47 = vunpack.i.h.bf16 %v1328_v54  ;;  %v1329_v48 = vunpack.i.l.bf16 %v1328_v54  ;;  %v1334_v38 = vunpack.i.l.bf16 %v1333_v49 }
  0xd6   : > { %v595_v50 = vsel %vm589_vm4, %v1729_v29, %v1330_v47  ;;  %v604_v60 = vsel %vm589_vm4, %v1732_v32, %v1329_v48  ;;  %v396_v32 = vsel %vm380_vm3, %v379_v46, %v364_v62 }
  0xd7   : > { %v612_v5 = vsel %vm606_vm5, %v595_v50, %v1335_v15  ;;  %v621_v57 = vsel %vm606_vm5, %v604_v60, %v1334_v38 }
  0xd8   : > { %763 = vmatmul.f32.gmra.mxu3 %v637_v16  ;;  %v629_v14 = vsel %vm623_vm6, %v612_v5, %v1340_v13  ;;  %1139 = vmatmul.msk.f32.gmra.mxu2 %vm589_vm4, %v381_v37  ;;  %v638_v29 = vsel %vm623_vm6, %v621_v57, %v1339_v55 }
  0xd9   : > { %739 = vmatmul.f32.gmra.mxu0 %v629_v14 }
  0xdb   : > { %v1348_v56 = vpop.permute.xlu1 %1347  ;;  %v1343_v59 = vpop.permute.xlu0 %1342 }
  0xdc   : > { %v1345_v63 = vunpack.i.h.bf16 %v1343_v59  ;;  %v1344_v6 = vunpack.i.l.bf16 %v1343_v59  ;;  %v1350_v61 = vunpack.i.h.bf16 %v1348_v56  ;;  %v1349_v7 = vunpack.i.l.bf16 %v1348_v56 }
  0xde   : > { %v596_v10 = vsel %vm589_vm4, %v1735_v33, %v1345_v63  ;;  %v605_v8 = vsel %vm589_vm4, %v1784_v58, %v1344_v6  ;;  %v793_v33 = vpop.f32.mrf.mxu1 }
  0xdf   : > { %v613_v11 = vsel %vm606_vm5, %v596_v10, %v1350_v61  ;;  %v622_v30 = vsel %vm606_vm5, %v605_v8, %v1349_v7 }
  0xe0   : > { %766 = vmatmul.f32.gmra.mxu3 %v638_v29  ;;  %1140 = vmatmul.msk.f32.gmra.mxu2 %vm589_vm4, %v396_v32  ;;  %v639_v62 = vsel %vm623_vm6, %v622_v30, %v572_v18  ;;  %v961_v18 = vld [vmem:[%s2150_s3 + $0x8] sm:$0xff] }
  0xe1   : > { %1012 = vmatpush.msra.mxu2 %v961_v18 }
  0xe3   : > { %v554_v12 = vpop.permute.xlu0 %553 }
  0xe4   : > { %v630_v9 = vsel %vm623_vm6, %v613_v11, %v554_v12 }
  0xe5   : > { %742 = vmatmul.f32.gmra.mxu0 %v630_v9 }
  0xe6   : > { %v796_v17 = vpop.f32.mrf.mxu1 }
  0xe8   : > { %769 = vmatmul.f32.gmra.mxu3 %v639_v62 }
  0xee   : > { %v799_v31 = vpop.f32.mrf.mxu1 }
  0xf6   : > { %v802_v58 = vpop.f32.mrf.mxu1 }
  0xfe   : > { %v805_v19 = vpop.f32.mrf.mxu1 }
 0x106   : > { %v2050_v20 = vpop.f32.mrf.mxu1 }
 0x10e   : > { %v2054_v23 = vpop.f32.mrf.mxu1 }
 0x116   : > { %v814_v51 = vpop.f32.mrf.mxu1 }
 0x11e   : > { %v817_v42 = vpop.f32.mrf.mxu1 }
 0x12e   : > { %v725_v39 = vpop.f32.mrf.mxu0 }
 0x12f   : > { %v791_v13 = vadd.f32 %v790_v35, %v725_v39 }
 0x131   : > { %v868_v14 = vsel %vm867_vm10, %v791_v13, -inf }
 0x133   : > { %v2052_v21 = vpop.f32.mrf.mxu2  ;;  %v749_v22 = vpop.f32.mrf.mxu3 }
 0x134   : > { %v815_v50 = vadd.f32 %v814_v51, %v749_v22 }
 0x136   : > { %v728_v2 = vpop.f32.mrf.mxu0  ;;  %v904_v61 = vsel %vm867_vm10, %v815_v50, -inf }
 0x137   : > { %v794_v43 = vadd.f32 %v793_v33, %v728_v2  ;;  %v960_v2 = vld [vmem:[%s2150_s3] sm:$0xff] }
 0x138   : > { %1013 = vmatpush.msra.mxu2 %v960_v2 }
 0x139   : > { %v852_v47 = vsel %vm2061_vm9, %v794_v43, -inf }
 0x13a   : > { %v869_v5 = vsel %vm867_vm10, %v852_v47, -inf }
 0x13b   : > { %v752_v3 = vpop.f32.mrf.mxu3  ;;  %v820_v24 = vpop.f32.mrf.mxu2  ;;  %v870_v59 = vmax.f32 %v868_v14, %v869_v5 }
 0x13c   : > { %v818_v54 = vadd.f32 %v817_v42, %v752_v3  ;;  %v812_v3 = vadd.f32 %v2054_v23, %v2052_v21 }
 0x13d   : > { %v871_v30 = vrot.slane %v870_v59, 4 }
 0x13e   : > { %v731_v26 = vpop.f32.mrf.mxu0  ;;  %v860_v38 = vsel %vm2061_vm9, %v818_v54, -inf }
 0x13f   : > { %v797_v46 = vadd.f32 %v796_v17, %v731_v26  ;;  %v905_v55 = vsel %vm867_vm10, %v860_v38, -inf }
 0x140   : > { %v906_v7 = vmax.f32 %v904_v61, %v905_v55 }
 0x141   : > { %v877_v48 = vsel %vm867_vm10, %v797_v46, -inf }
 0x142   : > { %v907_v17 = vrot.slane %v906_v7, 4 }
 0x143   : > { %v755_v28 = vpop.f32.mrf.mxu3  ;;  %v823_v52 = vpop.f32.mrf.mxu2 }
 0x144   : > { %v821_v63 = vadd.f32 %v820_v24, %v755_v28  ;;  %v872_v24 = vmax.f32 %v870_v59, %v871_v30  ;;  %v908_v27 = vmax.f32 %v906_v7, %v907_v17 }
 0x146   : > { %v734_v40 = vpop.f32.mrf.mxu0  ;;  %v913_v12 = vsel %vm867_vm10, %v821_v63, -inf  ;;  %v873_v21 = vrot.slane %v872_v24, 2  ;;  %v909_v43 = vrot.slane %v908_v27, 2 }
 0x147   : > { %v800_v41 = vadd.f32 %v799_v31, %v734_v40  ;;  %v858_v40 = vsel %vm2061_vm9, %v812_v3, -inf }
 0x148   : > { %v896_v54 = vsel %vm867_vm10, %v858_v40, -inf  ;;  %v910_v38 = vmax.f32 %v908_v27, %v909_v43 }
 0x149   : > { %v854_v4 = vsel %vm2061_vm9, %v800_v41, -inf }
 0x14a   : > { %v878_v15 = vsel %vm867_vm10, %v854_v4, -inf  ;;  %v911_v63 = vrot.slane %v910_v38, 1 }
 0x14b   : > { %v758_v49 = vpop.f32.mrf.mxu3  ;;  %v826_v53 = vpop.f32.mrf.mxu2  ;;  %v879_v16 = vmax.f32 %v877_v48, %v878_v15 }
 0x14c   : > { %v824_v37 = vadd.f32 %v823_v52, %v758_v49 }
 0x14d   : > { %v880_v56 = vrot.slane %v879_v16, 4 }
 0x14e   : > { %v737_v1 = vpop.f32.mrf.mxu0  ;;  %v862_v57 = vsel %vm2061_vm9, %v824_v37, -inf }
 0x14f   : > { %v803_v29 = vadd.f32 %v802_v58, %v737_v1  ;;  %v914_v10 = vsel %vm867_vm10, %v862_v57, -inf  ;;  %v881_v11 = vmax.f32 %v879_v16, %v880_v56  ;;  %v874_v1 = vmax.f32 %v872_v24, %v873_v21 }
 0x150   : > { %v915_v62 = vmax.f32 %v913_v12, %v914_v10 }
 0x151   : > { %v886_v35 = vsel %vm867_vm10, %v803_v29, -inf  ;;  %v882_v39 = vrot.slane %v881_v11, 2 }
 0x152   : > { %v916_v26 = vrot.slane %v915_v62, 4 }
 0x153   : > { %v761_v60 = vpop.f32.mrf.mxu3  ;;  %v829_v6 = vpop.f32.mrf.mxu2  ;;  %v883_v34 = vmax.f32 %v881_v11, %v882_v39 }
 0x154   : > { %v827_v31 = vadd.f32 %v826_v53, %v761_v60  ;;  %v917_v41 = vmax.f32 %v915_v62, %v916_v26  ;;  %v875_v60 = vrot.slane %v874_v1, 1 }
 0x155   : > { %v884_v15 = vrot.slane %v883_v34, 1 }
 0x156   : > { %v740_v32 = vpop.f32.mrf.mxu0  ;;  %v922_v44 = vsel %vm867_vm10, %v827_v31, -inf  ;;  %v918_v16 = vrot.slane %v917_v41, 2  ;;  %v876_v10 = vmax.f32 %v874_v1, %v875_v60 }
 0x157   : > { %v806_v8 = vadd.f32 %v805_v19, %v740_v32  ;;  %v885_v50 = vmax.f32 %v883_v34, %v884_v15 }
 0x158   : > { %v919_v57 = vmax.f32 %v917_v41, %v918_v16 }
 0x159   : > { %v856_v9 = vsel %vm2061_vm9, %v806_v8, -inf }
 0x15a   : > { %v887_v33 = vsel %vm867_vm10, %v856_v9, -inf  ;;  %v920_v18 = vrot.slane %v919_v57, 1  ;;  %v912_v9 = vmax.f32 %v910_v38, %v911_v63 }
 0x15b   : > { %v888_v58 = vmax.f32 %v886_v35, %v887_v33  ;;  %v764_v19 = vpop.f32.mrf.mxu3  ;;  %v832_v52 = vpop.f32.mrf.mxu2 }
 0x15c   : > { %v830_v22 = vadd.f32 %v829_v6, %v764_v19 }
 0x15d   : > { %v889_v25 = vrot.slane %v888_v58, 4 }
 0x15e   : > { %v864_v51 = vsel %vm2061_vm9, %v830_v22, -inf  ;;  %v921_v22 = vmax.f32 %v919_v57, %v920_v18 }
 0x15f   : > { %v890_v45 = vmax.f32 %v888_v58, %v889_v25  ;;  %v923_v28 = vsel %vm867_vm10, %v864_v51, -inf }
 0x160   : > { %v924_v36 = vmax.f32 %v922_v44, %v923_v28 }
 0x161   : > { %v891_v23 = vrot.slane %v890_v45, 2 }
 0x162   : > { %v925_v42 = vrot.slane %v924_v36, 4  ;;  %v743_v4 = vpop.f32.mrf.mxu0 }
 0x163   : > { %v892_v46 = vmax.f32 %v890_v45, %v891_v23  ;;  %v809_v49 = vadd.f32 %v2050_v20, %v743_v4  ;;  %v767_v53 = vpop.f32.mrf.mxu3  ;;  %v835_v56 = vpop.f32.mrf.mxu2  ;;  %v1351_v20 = vld [vmem:[%s2149_s2] ss:$0 sm:$0xff] }
 0x164   : > { %v926_v48 = vmax.f32 %v924_v36, %v925_v42  ;;  %v833_v6 = vadd.f32 %v832_v52, %v767_v53  ;;  %v945_v29 = vadd.f32 %v1351_v20, %v885_v50  ;;  %v944_v58 = vadd.f32 %v1351_v20, %v876_v10  ;;  %v1352_v50 = vld [vmem:[%s2151_s4] ss:$0 sm:$0xff] }
 0x165   : > { %v893_v47 = vrot.slane %v892_v46, 1  ;;  %v895_v13 = vsel %vm867_vm10, %v809_v49, -inf  ;;  %v948_v24 = vadd.f32 %v1351_v20, %v912_v9  ;;  %v949_v45 = vadd.f32 %v1351_v20, %v921_v22 }
 0x166   : > { %v897_v37 = vmax.f32 %v895_v13, %v896_v54  ;;  %v927_v55 = vrot.slane %v926_v48, 2  ;;  %v931_v62 = vsel %vm867_vm10, %v833_v6, -inf  ;;  %v953_v33 = vmax.f32 %v945_v29, 0.0 }
 0x167   : > { %v894_v14 = vmax.f32 %v892_v46, %v893_v47  ;;  %v952_v0 = vmax.f32 %v944_v58, 0.0  ;;  %v956_v34 = vmax.f32 %v948_v24, 0.0  ;;  %v957_v42 = vmax.f32 %v949_v45, 0.0 }
 0x168   : > { %v898_v5 = vrot.slane %v897_v37, 4  ;;  %v928_v11 = vmax.f32 %v926_v48, %v927_v55  ;;  %v975_v25 = vrot.slane %v953_v33, 7 }
 0x169   : > { %v946_v8 = vadd.f32 %v1351_v20, %v894_v14  ;;  %v984_v46 = vrot.slane %v956_v34, 4  ;;  %v987_v15 = vrot.slane %v957_v42, 3 }
 0x16a   : > { %v899_v59 = vmax.f32 %v897_v37, %v898_v5  ;;  %v929_v39 = vrot.slane %v928_v11, 1  ;;  %v977_v36 = vsel %vm976_vm11, %v975_v25, %v952_v0 }
 0x16b   : > { %v770_v61 = vpop.f32.mrf.mxu3  ;;  %v954_v19 = vmax.f32 %v946_v8, 0.0 }
 0x16c   : > { %v900_v32 = vrot.slane %v899_v59, 2  ;;  %v836_v7 = vadd.f32 %v835_v56, %v770_v61  ;;  %v930_v44 = vmax.f32 %v928_v11, %v929_v39 }
 0x16d   : > { %v978_v27 = vrot.slane %v954_v19, 6 }
 0x16e   : > { %v901_v30 = vmax.f32 %v899_v59, %v900_v32  ;;  %v866_v12 = vsel %vm2061_vm9, %v836_v7, -inf  ;;  %v950_v23 = vadd.f32 %v1351_v20, %v930_v44 }
 0x16f   : > { %v932_v35 = vsel %vm867_vm10, %v866_v12, -inf  ;;  %v980_v41 = vsel %vm979_vm12, %v978_v27, %v977_v36 }
 0x170   : > { %v902_v17 = vrot.slane %v901_v30, 1  ;;  %v933_v31 = vmax.f32 %v931_v62, %v932_v35  ;;  %v958_v53 = vmax.f32 %v950_v23, 0.0 }
 0x172   : > { %v903_v2 = vmax.f32 %v901_v30, %v902_v17  ;;  %v934_v3 = vrot.slane %v933_v31, 4  ;;  %v990_v13 = vrot.slane %v958_v53, 2 }
 0x174   : > { %v947_v26 = vadd.f32 %v1351_v20, %v903_v2  ;;  %v935_v51 = vmax.f32 %v933_v31, %v934_v3 }
 0x176   : > { %v955_v28 = vmax.f32 %v947_v26, 0.0  ;;  %v936_v52 = vrot.slane %v935_v51, 2 }
 0x178   : > { %v981_v40 = vrot.slane %v955_v28, 5  ;;  %v937_v21 = vmax.f32 %v935_v51, %v936_v52 }
 0x17a   : > { %v938_v4 = vrot.slane %v937_v21, 1  ;;  %v983_v43 = vsel %vm982_vm13, %v981_v40, %v980_v41 }
 0x17b   : > { %v986_v54 = vsel %vm985_vm14, %v984_v46, %v983_v43 }
 0x17c   : > { %v939_v49 = vmax.f32 %v937_v21, %v938_v4  ;;  %v989_v48 = vsel %vm988_vm15, %v987_v15, %v986_v54 }
 0x17d   : > { %v992_v37 = vsel %vm991_vm0, %v990_v13, %v989_v48 }
 0x17e   : > { %v951_v1 = vadd.f32 %v1351_v20, %v939_v49 }
 0x180   : > { %v959_v47 = vmax.f32 %v951_v1, 0.0 }
 0x182   : > { %v993_v16 = vrot.slane %v959_v47, 1 }
 0x184   : > { %v995_v38 = vsel %vm994_vm1, %v993_v16, %v992_v37 }
 0x185   : > { %1141 = vmatmul.msk.f32.vlgmr.msra.gmra.mxu2 %vm867_vm10, %v995_v38 }
 0x208   : > { %v1015_v5 = vpop.f32.mrf.mxu2 }
 0x209   : > { %v1016_v60 = vadd.f32 %v1352_v50, %v1015_v5 }
 0x20b   : > { %1018 = vmax.xlane.f32.xlu1 %v1016_v60 }
 0x27e   : > { %v1019_v14 = vpop.xlane.xlu1 %1018 }
 0x27f   : > { %v1020_v55 = vsub.f32 %v1016_v60, %v1019_v14 }
 0x281   : > { %v1021_v56 = vmul.f32 1.442695, %v1020_v55 }
 0x283   : > { %1353 = vpow2.f32 %v1021_v56 }
 0x289   : > { %v1354_v20 = vpop.eup %1353 }
 0x28a   : > { %1023 = vadd.xlane.f32.xlu2 %v1354_v20 }
 0x2fd   : > { %v1024_v57 = vpop.xlane.xlu2 %1023 }
 0x2fe   : > { %1355 = vlog2.f32 %v1024_v57 }
 0x304   : > { %v1356_v59 = vpop.eup %1355 }
 0x305   : > { %v1026_v63 = vmul.f32 0.6931472, %v1356_v59 }
 0x307   : > { %v1027_v6 = vsub.f32 %v1020_v55, %v1026_v63 }
 0x309   : > { %1028 = vst [vmem:[%s245_s17] sm:$0xff] %v1027_v6 }
 0x30a   : > { %1414 = shalt.err (!%p1411_p4)
}
 0x30b   : > { %1186 = dma.vmem_to_hbm [thread:$0]  (%p1541_p11), %s1043_s26, 128, %s1045_s8, %s1030_s13  }
 0x30c PF: > { %s1056_s12 = sand.u32 1, %s1441_s18   ;;  %p2160_p7 = scmp.ge.s32.totalorder %s1453_s21, 2 }
 0x30d   : > { %s1057_s11 = scalar_lea.sflag [#allocation4], %s1056_s12 }
 0x30e   : > { %p1193_p5 = pnand %p2160_p7, %p1545_p12 }
 0x310   : > { %p1194_p8 = pneg %p1193_p5 }
 0x312   : > { %1436 = dma.done.wait (%p1194_p8), %s1057_s11, 128  }
 0x313   : > { %1438 = vsyncadd (%p1194_p8), %s1057_s11, 4294967168  ;;  %p18_p10 = scmp.ge.s32.totalorder %s1516_s24, 4   ;;  %s2161_s18 = smov %s1445_s19 }
 0x314   : > { %s2162_s19 = smov %s1449_s20  ;;  %s2163_s20 = smov %s1528_s27 }
 0x315   : > { %s2164_s21 = smov %s1516_s24  ;;  %20 = sbr.rel (!%p18_p10) target bundleno = 5 (0x5), region = 85 }
 0x31a   :  { %1063 = vsyncpa [#allocation3], 1 }
 0x31b   :  { %1065 = vsyncpa [#allocation3 + $0x1], 1 }
 0x31c   :  { %1066 = vsyncpa [#allocation4], 1 }
 0x31d   :  { %1068 = vsyncpa [#allocation4 + $0x1], 1 }

</bundles_post_ra>
